<compile_context>
chip_gen: v6e
topology: v6e:2x2x1
jax: 0.10.0
libtpu: 0.0.40
codegen_flags: <defaults>
</compile_context>

<pallas_src>
import jax
import jax.numpy as jnp
from jax import lax
from jax.experimental import pallas as pl
from jax.experimental.pallas import tpu as pltpu


def encoder_seq_kernel(ids_ref,                 # VMEM (1, B, 1) int32: token ids for step t
                       emb_ref,                 # VMEM (V, H)  embedding table (resident)
                       c0_ref, h0_ref,          # VMEM (B, H)  initial recurrent state
                       wi_ref, wh_ref,          # VMEM (H, 4H) W_i2h^T / W_h2h^T (resident)
                       b_ref,                   # VMEM (1, 4H) b_i2h + b_h2h (resident)
                       hy_all_ref,              # VMEM (1, B, H) per-step hy output block
                       cy_ref, hy_ref,          # VMEM (B, H)  final cy / hy (resident)
                       gtab_st, c_st, h_st):    # VMEM scratch: (V,4H), (B,H), (B,H)
    t = pl.program_id(0)
    n_t = pl.num_programs(0)
    B, H = h_st.shape
    V = gtab_st.shape[0]

    # ---- one-time work: hoist the i2h matmul off the recurrent critical path ----
    @pl.when(t == 0)
    def _():
        gtab_st[...] = (
            jnp.dot(emb_ref[...], wi_ref[...],
                    preferred_element_type=jnp.float32,
                    precision=lax.Precision.HIGHEST)
            + b_ref[...])                                  # (V, 4H) per-token gate table
        c_st[...] = c0_ref[...]
        h_st[...] = h0_ref[...]

    # ---- vectorized embedding gather: one-hot(B,V) @ gtab(V,4H) on the MXU ----
    ids = ids_ref[0]                                       # (B, 1) int32
    col = lax.broadcasted_iota(jnp.int32, (B, V), 1)       # (B, V) column ids
    onehot = (col == ids).astype(jnp.float32)              # (B, V) one-hot rows
    gate_x = jnp.dot(onehot, gtab_st[...],
                     preferred_element_type=jnp.float32,
                     precision=lax.Precision.HIGHEST)      # exact row selection, (B, 4H)

    # ---- only the recurrent half of the gates stays on the serial path ----
    gate_h = jnp.dot(h_st[...], wh_ref[...],
                     preferred_element_type=jnp.float32,
                     precision=lax.Precision.HIGHEST)      # (B, 4H)
    gates = gate_x + gate_h

    if H % 128 == 0:
        # Lane-aligned slices: compute only the transcendentals we need (5H cols).
        ingate     = jax.nn.sigmoid(gates[:, 0 * H:1 * H])
        forgetgate = jax.nn.sigmoid(gates[:, 1 * H:2 * H])
        cellgate   = jnp.tanh(gates[:,       2 * H:3 * H])
        outgate    = jax.nn.sigmoid(gates[:, 3 * H:4 * H])
    else:
        # Sub-lane H: two full-vreg EUP passes beat four sub-vreg passes.
        sig = jax.nn.sigmoid(gates)
        th = jnp.tanh(gates)
        ingate     = sig[:, 0 * H:1 * H]
        forgetgate = sig[:, 1 * H:2 * H]
        cellgate   = th[:,  2 * H:3 * H]
        outgate    = sig[:, 3 * H:4 * H]

    cy = forgetgate * c_st[...] + ingate * cellgate
    hy = outgate * jnp.tanh(cy)

    # Carry the recurrent state to the next grid step.
    c_st[...] = cy
    h_st[...] = hy

    # Per-step hy block: written back (double-buffered) while the next step computes.
    hy_all_ref[...] = hy[None].astype(hy_all_ref.dtype)

    # Final-state outputs only matter on the last step.
    @pl.when(t == n_t - 1)
    def _():
        cy_ref[...] = cy.astype(cy_ref.dtype)
        hy_ref[...] = hy.astype(hy_ref.dtype)


def encoder_forward_seq(input_src_seq, prev_c, prev_h, params):
    """Run the Encoder over a whole token sequence in a single pallas_call.

    input_src_seq: (T, B) int32 token ids.
    Returns (hy_all (T, B, H), final cy (B, H), final hy (B, H)).
    Each step reproduces Encoder.forward exactly (embedding + LSTM cell, dropout=0).
    """
    emb = params["embedding"]                              # (V, H)
    wi_t = params["w_i2h"].T                               # (H, 4H)
    wh_t = params["w_h2h"].T                               # (H, 4H)
    b_fused = (params["b_i2h"] + params["b_h2h"])[None, :]  # (1, 4H)

    T, B = input_src_seq.shape
    V, H = emb.shape
    ids3 = input_src_seq.astype(jnp.int32).reshape(T, B, 1)

    grid_spec = pltpu.PrefetchScalarGridSpec(
        num_scalar_prefetch=0,
        grid=(T,),
        in_specs=[
            pl.BlockSpec((1, B, 1), lambda t: (t, 0, 0)),      # token ids for step t
            pl.BlockSpec((V, H), lambda t: (0, 0)),            # embedding (resident)
            pl.BlockSpec((B, H), lambda t: (0, 0)),            # prev_c
            pl.BlockSpec((B, H), lambda t: (0, 0)),            # prev_h
            pl.BlockSpec((H, 4 * H), lambda t: (0, 0)),        # W_i2h^T
            pl.BlockSpec((H, 4 * H), lambda t: (0, 0)),        # W_h2h^T
            pl.BlockSpec((1, 4 * H), lambda t: (0, 0)),        # fused bias
        ],
        out_specs=(
            pl.BlockSpec((1, B, H), lambda t: (t, 0, 0)),      # hy per step (pipelined)
            pl.BlockSpec((B, H), lambda t: (0, 0)),            # final cy
            pl.BlockSpec((B, H), lambda t: (0, 0)),            # final hy
        ),
        scratch_shapes=[
            pltpu.VMEM((V, 4 * H), jnp.float32),   # per-token gate table (x@Wi^T + b)
            pltpu.VMEM((B, H), jnp.float32),       # c carry
            pltpu.VMEM((B, H), jnp.float32),       # h carry
        ],
    )

    out_shapes = (
        jax.ShapeDtypeStruct((T, B, H), jnp.float32),
        jax.ShapeDtypeStruct((B, H), jnp.float32),
        jax.ShapeDtypeStruct((B, H), jnp.float32),
    )

    return pl.pallas_call(
        encoder_seq_kernel,
        out_shape=out_shapes,
        grid_spec=grid_spec,
        compiler_params=pltpu.CompilerParams(
            dimension_semantics=("arbitrary",)),   # sequential carry over time
    )(ids3, emb, prev_c, prev_h, wi_t, wh_t, b_fused)


def encoder_forward(input_src, prev_c, prev_h, params):
    """Single-step Encoder.forward (matches the PyTorch module interface)."""
    _, cy, hy = encoder_forward_seq(input_src[None, :], prev_c, prev_h, params)
    return cy, hy


def init_params(key, vocab_size, hidden_size, init_weight=0.08):
    """Deterministic init matching nn.init.uniform_(-init_weight, init_weight)."""
    ks = jax.random.split(key, 5)
    u = lambda k, shape: jax.random.uniform(
        k, shape, dtype=jnp.float32, minval=-init_weight, maxval=init_weight)
    return {
        "embedding": u(ks[0], (vocab_size, hidden_size)),
        "w_i2h": u(ks[1], (4 * hidden_size, hidden_size)),   # PyTorch Linear weight (out, in)
        "b_i2h": u(ks[2], (4 * hidden_size,)),
        "w_h2h": u(ks[3], (4 * hidden_size, hidden_size)),
        "b_h2h": u(ks[4], (4 * hidden_size,)),
    }


def _reference_step(tok, prev_c, prev_h, params):
    """Pure-JAX reference of the PyTorch forward for one timestep (f32 matmuls)."""
    x = jnp.take(params["embedding"], tok, axis=0)
    gates = (jnp.dot(x, params["w_i2h"].T, precision=lax.Precision.HIGHEST)
             + params["b_i2h"]
             + jnp.dot(prev_h, params["w_h2h"].T, precision=lax.Precision.HIGHEST)
             + params["b_h2h"])
    H = x.shape[1]
    i = jax.nn.sigmoid(gates[:, 0:H])
    f = jax.nn.sigmoid(gates[:, H:2 * H])
    g = jnp.tanh(gates[:, 2 * H:3 * H])
    o = jax.nn.sigmoid(gates[:, 3 * H:4 * H])
    cy = f * prev_c + i * g
    hy = o * jnp.tanh(cy)
    return cy, hy


def _reference_seq(tokens, prev_c, prev_h, params):
    def step(carry, tok):
        c, h = carry
        cy, hy = _reference_step(tok, c, h, params)
        return (cy, hy), hy
    (cy, hy), hy_all = jax.lax.scan(step, (prev_c, prev_h), tokens)
    return hy_all, cy, hy


if __name__ == "__main__":
    VOCAB = 16
    HIDDEN = 32
    BATCH = 8
    SEQ = 8

    key = jax.random.PRNGKey(0)
    kp, kc, kh, ki = jax.random.split(key, 4)

    params = init_params(kp, VOCAB, HIDDEN)
    tokens = jax.random.randint(ki, (SEQ, BATCH), 0, VOCAB, dtype=jnp.int32)
    prev_c = jax.random.normal(kc, (BATCH, HIDDEN), dtype=jnp.float32)
    prev_h = jax.random.normal(kh, (BATCH, HIDDEN), dtype=jnp.float32)

    # Single-step call: exact Encoder.forward(input_src, prev_c, prev_h) semantics.
    cy1, hy1 = encoder_forward(tokens[0], prev_c, prev_h, params)
    cy1 = jax.block_until_ready(cy1)
    hy1 = jax.block_until_ready(hy1)
    cy1_ref, hy1_ref = _reference_step(tokens[0], prev_c, prev_h, params)
    assert jnp.allclose(cy1, cy1_ref, atol=1e-4, rtol=1e-4)
    assert jnp.allclose(hy1, hy1_ref, atol=1e-4, rtol=1e-4)

    # Full sequence fused into one kernel call (time loop on the grid).
    hy_all, cy, hy = encoder_forward_seq(tokens, prev_c, prev_h, params)
    hy_all = jax.block_until_ready(hy_all)
    hy_all_ref, cy_ref, hy_ref = _reference_seq(tokens, prev_c, prev_h, params)
    assert jnp.allclose(hy_all, hy_all_ref, atol=2e-4, rtol=2e-4)
    assert jnp.allclose(cy, cy_ref, atol=2e-4, rtol=2e-4)
    assert jnp.allclose(hy, hy_ref, atol=2e-4, rtol=2e-4)

    print("KERNEL_OK")
</pallas_src>

<mosaic_0001>
module attributes {stable_mosaic.version = 11 : i64} {
  func.func @encoder_seq_kernel(%arg0: i32, %arg1: memref<1x8x1xi32, #tpu.memory_space<vmem>>, %arg2: memref<16x32xf32, #tpu.memory_space<vmem>>, %arg3: memref<8x32xf32, #tpu.memory_space<vmem>>, %arg4: memref<8x32xf32, #tpu.memory_space<vmem>>, %arg5: memref<32x128xf32, #tpu.memory_space<vmem>>, %arg6: memref<32x128xf32, #tpu.memory_space<vmem>>, %arg7: memref<1x128xf32, #tpu.memory_space<vmem>>, %arg8: memref<1x8x32xf32, #tpu.memory_space<vmem>>, %arg9: memref<8x32xf32, #tpu.memory_space<vmem>>, %arg10: memref<8x32xf32, #tpu.memory_space<vmem>>, %arg11: memref<16x128xf32, #tpu.memory_space<vmem>>, %arg12: memref<8x32xf32, #tpu.memory_space<vmem>>, %arg13: memref<8x32xf32, #tpu.memory_space<vmem>>) attributes {dimension_semantics = [#tpu.dimension_semantics<arbitrary>], iteration_bounds = array<i64: 1>, scalar_prefetch = 0 : i64, scratch_operands = 3 : i64, tpu.core_type = #tpu.core_type<tc>, window_params = [{transform_indices = @transform_0, window_bounds = array<i64: 1, 8, 1>}, {pipeline_mode = #tpu.pipeline_mode<synchronous>, transform_indices = @transform_1, window_bounds = array<i64: 16, 32>}, {pipeline_mode = #tpu.pipeline_mode<synchronous>, transform_indices = @transform_2, window_bounds = array<i64: 8, 32>}, {pipeline_mode = #tpu.pipeline_mode<synchronous>, transform_indices = @transform_3, window_bounds = array<i64: 8, 32>}, {pipeline_mode = #tpu.pipeline_mode<synchronous>, transform_indices = @transform_4, window_bounds = array<i64: 32, 128>}, {pipeline_mode = #tpu.pipeline_mode<synchronous>, transform_indices = @transform_5, window_bounds = array<i64: 32, 128>}, {pipeline_mode = #tpu.pipeline_mode<synchronous>, transform_indices = @transform_6, window_bounds = array<i64: 1, 128>}, {transform_indices = @transform_7, window_bounds = array<i64: 1, 8, 32>}, {pipeline_mode = #tpu.pipeline_mode<synchronous>, transform_indices = @transform_8, window_bounds = array<i64: 8, 32>}, {pipeline_mode = #tpu.pipeline_mode<synchronous>, transform_indices = @transform_9, window_bounds = array<i64: 8, 32>}]} {
    %c0_i32 = arith.constant 0 : i32
    %0 = arith.cmpi eq, %arg0, %c0_i32 : i32
    %1 = arith.extui %0 : i1 to i32
    %c0_i32_0 = arith.constant 0 : i32
    %2 = arith.cmpi ne, %1, %c0_i32_0 : i32
    scf.if %2 {
      %c0_22 = arith.constant 0 : index
      %c0_23 = arith.constant 0 : index
      %39 = vector.load %arg2[%c0_22, %c0_23] : memref<16x32xf32, #tpu.memory_space<vmem>>, vector<16x32xf32>
      %c0_24 = arith.constant 0 : index
      %c0_25 = arith.constant 0 : index
      %40 = vector.load %arg5[%c0_24, %c0_25] : memref<32x128xf32, #tpu.memory_space<vmem>>, vector<32x128xf32>
      %cst_26 = arith.constant dense<0.000000e+00> : vector<16x128xf32>
      %41 = tpu.matmul %39, %40, %cst_26 {dimension_numbers = #tpu.dot_dimension_numbers<[1], [0], [0], [1], [0, 0, 1, 1], [], []>, precision = #tpu.contract_precision<fp32>} : vector<16x32xf32>, vector<32x128xf32>, vector<16x128xf32> -> vector<16x128xf32>
      %c0_27 = arith.constant 0 : index
      %c0_28 = arith.constant 0 : index
      %42 = vector.load %arg7[%c0_27, %c0_28] : memref<1x128xf32, #tpu.memory_space<vmem>>, vector<1x128xf32>
      %43 = vector.broadcast %42 : vector<1x128xf32> to vector<16x128xf32>
      %44 = arith.addf %41, %43 : vector<16x128xf32>
      %c0_29 = arith.constant 0 : index
      %c0_30 = arith.constant 0 : index
      %45 = vector.load %arg11[%c0_29, %c0_30] : memref<16x128xf32, #tpu.memory_space<vmem>>, vector<16x128xf32>
      tpu.vector_store %arg11[%c0_29, %c0_30], %44 {strides = array<i32>} : memref<16x128xf32, #tpu.memory_space<vmem>>, vector<16x128xf32>,
      %c0_31 = arith.constant 0 : index
      %c0_32 = arith.constant 0 : index
      %46 = vector.load %arg3[%c0_31, %c0_32] : memref<8x32xf32, #tpu.memory_space<vmem>>, vector<8x32xf32>
      %c0_33 = arith.constant 0 : index
      %c0_34 = arith.constant 0 : index
      %47 = vector.load %arg12[%c0_33, %c0_34] : memref<8x32xf32, #tpu.memory_space<vmem>>, vector<8x32xf32>
      tpu.vector_store %arg12[%c0_33, %c0_34], %46 {strides = array<i32>} : memref<8x32xf32, #tpu.memory_space<vmem>>, vector<8x32xf32>,
      %c0_35 = arith.constant 0 : index
      %c0_36 = arith.constant 0 : index
      %48 = vector.load %arg4[%c0_35, %c0_36] : memref<8x32xf32, #tpu.memory_space<vmem>>, vector<8x32xf32>
      %c0_37 = arith.constant 0 : index
      %c0_38 = arith.constant 0 : index
      %49 = vector.load %arg13[%c0_37, %c0_38] : memref<8x32xf32, #tpu.memory_space<vmem>>, vector<8x32xf32>
      tpu.vector_store %arg13[%c0_37, %c0_38], %48 {strides = array<i32>} : memref<8x32xf32, #tpu.memory_space<vmem>>, vector<8x32xf32>,
    } else {
    }
    %c0 = arith.constant 0 : index
    %c0_1 = arith.constant 0 : index
    %c0_2 = arith.constant 0 : index
    %3 = vector.load %arg1[%c0, %c0_1, %c0_2] : memref<1x8x1xi32, #tpu.memory_space<vmem>>, vector<1x8x1xi32>
    %4 = vector.shape_cast %3 : vector<1x8x1xi32> to vector<8x1xi32>
    %5 = tpu.iota {dimensions = array<i32: 1>} : vector<8x16xi32>
    %6 = vector.broadcast %4 : vector<8x1xi32> to vector<8x16xi32>
    %7 = arith.cmpi eq, %5, %6 : vector<8x16xi32>
    %8 = arith.extui %7 : vector<8x16xi1> to vector<8x16xi32>
    %9 = arith.sitofp %8 : vector<8x16xi32> to vector<8x16xf32>
    %c0_3 = arith.constant 0 : index
    %c0_4 = arith.constant 0 : index
    %10 = vector.load %arg11[%c0_3, %c0_4] : memref<16x128xf32, #tpu.memory_space<vmem>>, vector<16x128xf32>
    %cst = arith.constant dense<0.000000e+00> : vector<8x128xf32>
    %11 = tpu.matmul %9, %10, %cst {dimension_numbers = #tpu.dot_dimension_numbers<[1], [0], [0], [1], [0, 0, 1, 1], [], []>, precision = #tpu.contract_precision<fp32>} : vector<8x16xf32>, vector<16x128xf32>, vector<8x128xf32> -> vector<8x128xf32>
    %c0_5 = arith.constant 0 : index
    %c0_6 = arith.constant 0 : index
    %12 = vector.load %arg13[%c0_5, %c0_6] : memref<8x32xf32, #tpu.memory_space<vmem>>, vector<8x32xf32>
    %c0_7 = arith.constant 0 : index
    %c0_8 = arith.constant 0 : index
    %13 = vector.load %arg6[%c0_7, %c0_8] : memref<32x128xf32, #tpu.memory_space<vmem>>, vector<32x128xf32>
    %cst_9 = arith.constant dense<0.000000e+00> : vector<8x128xf32>
    %14 = tpu.matmul %12, %13, %cst_9 {dimension_numbers = #tpu.dot_dimension_numbers<[1], [0], [0], [1], [0, 0, 1, 1], [], []>, precision = #tpu.contract_precision<fp32>} : vector<8x32xf32>, vector<32x128xf32>, vector<8x128xf32> -> vector<8x128xf32>
    %15 = arith.addf %11, %14 : vector<8x128xf32>
    %16 = arith.negf %15 : vector<8x128xf32>
    %17 = math.exp %16 : vector<8x128xf32>
    %cst_10 = arith.constant 1.000000e+00 : f32
    %18 = vector.broadcast %cst_10 : f32 to vector<8x128xf32>
    %19 = arith.addf %18, %17 : vector<8x128xf32>
    %20 = arith.divf %18, %19 : vector<8x128xf32>
    %21 = math.tanh %15 : vector<8x128xf32>
    %22 = vector.extract_strided_slice %20 {offsets = [0, 0], sizes = [8, 32], strides = [1, 1]} : vector<8x128xf32> to vector<8x32xf32>
    %23 = vector.extract_strided_slice %20 {offsets = [0, 32], sizes = [8, 32], strides = [1, 1]} : vector<8x128xf32> to vector<8x32xf32>
    %24 = vector.extract_strided_slice %21 {offsets = [0, 64], sizes = [8, 32], strides = [1, 1]} : vector<8x128xf32> to vector<8x32xf32>
    %25 = vector.extract_strided_slice %20 {offsets = [0, 96], sizes = [8, 32], strides = [1, 1]} : vector<8x128xf32> to vector<8x32xf32>
    %c0_11 = arith.constant 0 : index
    %c0_12 = arith.constant 0 : index
    %26 = vector.load %arg12[%c0_11, %c0_12] : memref<8x32xf32, #tpu.memory_space<vmem>>, vector<8x32xf32>
    %27 = arith.mulf %23, %26 : vector<8x32xf32>
    %28 = arith.mulf %22, %24 : vector<8x32xf32>
    %29 = arith.addf %27, %28 : vector<8x32xf32>
    %30 = math.tanh %29 : vector<8x32xf32>
    %31 = arith.mulf %25, %30 : vector<8x32xf32>
    %c0_13 = arith.constant 0 : index
    %c0_14 = arith.constant 0 : index
    %32 = vector.load %arg12[%c0_13, %c0_14] : memref<8x32xf32, #tpu.memory_space<vmem>>, vector<8x32xf32>
    tpu.vector_store %arg12[%c0_13, %c0_14], %29 {strides = array<i32>} : memref<8x32xf32, #tpu.memory_space<vmem>>, vector<8x32xf32>,
    %c0_15 = arith.constant 0 : index
    %c0_16 = arith.constant 0 : index
    %33 = vector.load %arg13[%c0_15, %c0_16] : memref<8x32xf32, #tpu.memory_space<vmem>>, vector<8x32xf32>
    tpu.vector_store %arg13[%c0_15, %c0_16], %31 {strides = array<i32>} : memref<8x32xf32, #tpu.memory_space<vmem>>, vector<8x32xf32>,
    %34 = vector.shape_cast %31 : vector<8x32xf32> to vector<1x8x32xf32>
    %c0_17 = arith.constant 0 : index
    %c0_18 = arith.constant 0 : index
    %c0_19 = arith.constant 0 : index
    %35 = vector.load %arg8[%c0_17, %c0_18, %c0_19] : memref<1x8x32xf32, #tpu.memory_space<vmem>>, vector<1x8x32xf32>
    tpu.vector_store %arg8[%c0_17, %c0_18, %c0_19], %34 {strides = array<i32>} : memref<1x8x32xf32, #tpu.memory_space<vmem>>, vector<1x8x32xf32>,
    %c0_i32_20 = arith.constant 0 : i32
    %36 = arith.cmpi eq, %arg0, %c0_i32_20 : i32
    %37 = arith.extui %36 : i1 to i32
    %c0_i32_21 = arith.constant 0 : i32
    %38 = arith.cmpi ne, %37, %c0_i32_21 : i32
    scf.if %38 {
      %c0_22 = arith.constant 0 : index
      %c0_23 = arith.constant 0 : index
      %39 = vector.load %arg9[%c0_22, %c0_23] : memref<8x32xf32, #tpu.memory_space<vmem>>, vector<8x32xf32>
      tpu.vector_store %arg9[%c0_22, %c0_23], %29 {strides = array<i32>} : memref<8x32xf32, #tpu.memory_space<vmem>>, vector<8x32xf32>,
      %c0_24 = arith.constant 0 : index
      %c0_25 = arith.constant 0 : index
      %40 = vector.load %arg10[%c0_24, %c0_25] : memref<8x32xf32, #tpu.memory_space<vmem>>, vector<8x32xf32>
      tpu.vector_store %arg10[%c0_24, %c0_25], %31 {strides = array<i32>} : memref<8x32xf32, #tpu.memory_space<vmem>>, vector<8x32xf32>,
    } else {
    }
    return
  }
  func.func @transform_0(%arg0: i32) -> (i32, i32, i32) {
    %c0_i32 = arith.constant 0 : i32
    %c0_i32_0 = arith.constant 0 : i32
    %c0_i32_1 = arith.constant 0 : i32
    return %arg0, %c0_i32, %c0_i32_0 : i32, i32, i32
  }
  func.func @transform_1(%arg0: i32) -> (i32, i32) {
    %c0_i32 = arith.constant 0 : i32
    %c0_i32_0 = arith.constant 0 : i32
    %c0_i32_1 = arith.constant 0 : i32
    return %c0_i32, %c0_i32_0 : i32, i32
  }
  func.func @transform_2(%arg0: i32) -> (i32, i32) {
    %c0_i32 = arith.constant 0 : i32
    %c0_i32_0 = arith.constant 0 : i32
    %c0_i32_1 = arith.constant 0 : i32
    return %c0_i32, %c0_i32_0 : i32, i32
  }
  func.func @transform_3(%arg0: i32) -> (i32, i32) {
    %c0_i32 = arith.constant 0 : i32
    %c0_i32_0 = arith.constant 0 : i32
    %c0_i32_1 = arith.constant 0 : i32
    return %c0_i32, %c0_i32_0 : i32, i32
  }
  func.func @transform_4(%arg0: i32) -> (i32, i32) {
    %c0_i32 = arith.constant 0 : i32
    %c0_i32_0 = arith.constant 0 : i32
    %c0_i32_1 = arith.constant 0 : i32
    return %c0_i32, %c0_i32_0 : i32, i32
  }
  func.func @transform_5(%arg0: i32) -> (i32, i32) {
    %c0_i32 = arith.constant 0 : i32
    %c0_i32_0 = arith.constant 0 : i32
    %c0_i32_1 = arith.constant 0 : i32
    return %c0_i32, %c0_i32_0 : i32, i32
  }
  func.func @transform_6(%arg0: i32) -> (i32, i32) {
    %c0_i32 = arith.constant 0 : i32
    %c0_i32_0 = arith.constant 0 : i32
    %c0_i32_1 = arith.constant 0 : i32
    return %c0_i32, %c0_i32_0 : i32, i32
  }
  func.func @transform_7(%arg0: i32) -> (i32, i32, i32) {
    %c0_i32 = arith.constant 0 : i32
    %c0_i32_0 = arith.constant 0 : i32
    %c0_i32_1 = arith.constant 0 : i32
    return %arg0, %c0_i32, %c0_i32_0 : i32, i32, i32
  }
  func.func @transform_8(%arg0: i32) -> (i32, i32) {
    %c0_i32 = arith.constant 0 : i32
    %c0_i32_0 = arith.constant 0 : i32
    %c0_i32_1 = arith.constant 0 : i32
    return %c0_i32, %c0_i32_0 : i32, i32
  }
  func.func @transform_9(%arg0: i32) -> (i32, i32) {
    %c0_i32 = arith.constant 0 : i32
    %c0_i32_0 = arith.constant 0 : i32
    %c0_i32_1 = arith.constant 0 : i32
    return %c0_i32, %c0_i32_0 : i32, i32
  }
}

</mosaic_0001>

<bundles_post_ra>
// kernel: tpu_custom_call.1
= control target key start
LH: loop header
LB: loop body
LE: loop exit
PB: predicated region body
PF: predicated region fallthrough
CT: control target
= control target key end

     0   :  { %15 = vsyncpa [#allocation6], 0  ;;  %s2408_s0 = inlined_call_operand.vmem [shape: s32[1,8,1], index: 0, kind: input, shape index: {}]   ;;  %s2409_s1 = inlined_call_operand.hbm [shape: f32[16,32], index: 1, kind: input, shape index: {}]   ;;  %s2410_s2 = inlined_call_operand.vmem [shape: f32[8,32], index: 2, kind: input, shape index: {}]   ;;  %s2411_s3 = inlined_call_operand.hbm [shape: f32[8,32], index: 3, kind: input, shape index: {}]   ;;  %s2412_s4 = inlined_call_operand.hbm [shape: f32[32,128], index: 4, kind: input, shape index: {}]   ;;  %s2413_s5 = inlined_call_operand.hbm [shape: f32[32,128], index: 5, kind: input, shape index: {}]   ;;  %s2414_s6 = inlined_call_operand.vmem [shape: f32[1,128], index: 6, kind: input, shape index: {}]   ;;  %s2415_s7 = inlined_call_operand.hbm [shape: f32[1,8,32], index: 7, kind: output, shape index: {0}]   ;;  %s2416_s8 = inlined_call_operand.hbm [shape: f32[8,32], index: 8, kind: output, shape index: {1}]   ;;  %s2417_s9 = inlined_call_operand.hbm [shape: f32[8,32], index: 9, kind: output, shape index: {2}]  }
   0x1   :  { %16 = vsyncpa [#allocation9], 0 }
   0x2   :  { %17 = vsyncpa [#allocation12], 0 }
   0x3   :  { %18 = vsyncpa [#allocation7], 0 }
   0x4   :  { %19 = vsyncpa [#allocation15], 0  ;;  %s2137_s30 = smov [#allocation8]   ;;  %s2138_s11 = smov [#allocation5]  }
   0x5   :  { %s42_s10 = sshll.u32 %s2137_s30, 4  ;;  %s27_s12 = sshll.u32 %s2138_s11, 4  ;;  %s43_s10 = int_to_ptr.vmem [resolvable:$true] %s42_s10  ;;  %s28_s12 = int_to_ptr.vmem [resolvable:$true] %s27_s12 }
   0x6   :  { %s1995_s13 = scalar_lea.vmem %s43_s10, 128  ;;  %p2000_p1 = scmp.lt.s32.totalorder %s43_s10, %s43_s10 }
   0x7   :  { %p1996_p0 = scmp.ne.s32.totalorder %s43_s10, %s1995_s13  ;;  %p2001_p2 = scmp.lt.s32.totalorder %s1995_s13, %s1995_s13 }
   0x9   :  { %p2002_p3 = por %p2001_p2, %p2000_p1 }
   0xb   :  { %p2003_p4 = pnand %p2002_p3, %p1996_p0 }
   0xd   :  { %2006 = shalt.err (!%p2003_p4)
}
   0xe   :  { %45 = dma.hbm_to_vmem [thread:$0]  %s2411_s3, 128, %s43_s10, [#allocation9]  }
   0xf   :  { %s2015_s16 = scalar_lea.vmem %s28_s12, 256  ;;  %p2020_p6 = scmp.lt.s32.totalorder %s28_s12, %s28_s12 }
  0x10   :  { %p2016_p5 = scmp.ne.s32.totalorder %s28_s12, %s2015_s16  ;;  %p2021_p7 = scmp.lt.s32.totalorder %s2015_s16, %s2015_s16 }
  0x12   :  { %p2022_p8 = por %p2021_p7, %p2020_p6 }
  0x14   :  { %p2023_p9 = pnand %p2022_p8, %p2016_p5 }
  0x16   :  { %2026 = shalt.err (!%p2023_p9)
}
  0x17   :  { %s2139_s17 = smov 128   ;;  %s2140_s18 = smov 8  }
  0x18   :  { %33 = dma.hbm_to_vmem [thread:$0]  %s2409_s1, 256, %s28_s12, [#allocation6], %s2139_s17, %s2139_s17, %s2140_s18  }
  0x19   :  { %s2141_s21 = smov [#allocation10]   ;;  %s2142_s23 = smov [#allocation11]  }
  0x1a   :  { %s51_s22 = sshll.u32 %s2141_s21, 4  ;;  %s63_s24 = sshll.u32 %s2142_s23, 4  ;;  %s52_s22 = int_to_ptr.vmem [resolvable:$true] %s51_s22  ;;  %s64_s24 = int_to_ptr.vmem [resolvable:$true] %s63_s24 }
  0x1b   :  { %s2035_s3 = scalar_lea.vmem %s52_s22, 512  ;;  %p2040_p11 = scmp.lt.s32.totalorder %s52_s22, %s52_s22 }
  0x1c   :  { %p2036_p10 = scmp.ne.s32.totalorder %s52_s22, %s2035_s3  ;;  %p2041_p12 = scmp.lt.s32.totalorder %s2035_s3, %s2035_s3 }
  0x1e   :  { %p2042_p13 = por %p2041_p12, %p2040_p11 }
  0x20   :  { %p2043_p0 = pnand %p2042_p13, %p2036_p10 }
  0x22   :  { %2046 = shalt.err (!%p2043_p0)
}
  0x23   :  { %57 = dma.hbm_to_vmem [thread:$0]  %s2412_s4, 512, %s52_s22, [#allocation9], %s2139_s17, %s2139_s17, %s2140_s18  }
  0x24   :  { %s2055_s27 = scalar_lea.vmem %s64_s24, 512  ;;  %p2060_p2 = scmp.lt.s32.totalorder %s64_s24, %s64_s24 }
  0x25   :  { %p2056_p1 = scmp.ne.s32.totalorder %s64_s24, %s2055_s27  ;;  %p2061_p3 = scmp.lt.s32.totalorder %s2055_s27, %s2055_s27 }
  0x27   :  { %p2062_p4 = por %p2061_p3, %p2060_p2 }
  0x29   :  { %p2063_p5 = pnand %p2062_p4, %p2056_p1 }
  0x2b   :  { %2066 = shalt.err (!%p2063_p5)
}
  0x2c   :  { %69 = dma.hbm_to_vmem [thread:$0]  %s2413_s5, 512, %s64_s24, [#allocation12], %s2139_s17, %s2139_s17, %s2140_s18  }
  0x2d   :  { %2127 = dma.done.wait [#allocation6], 256  }
  0x2e   :  { %2128 = vsyncadd [#allocation6], 4294967040 }
  0x2f   :  { %2129 = dma.done.wait [#allocation9], 640  }
  0x30   :  { %2130 = vsyncadd [#allocation9], 4294966656 }
  0x31   :  { %2131 = dma.done.wait [#allocation12], 512  }
  0x32   :  { %2132 = vsyncadd [#allocation12], 4294966784  ;;  %v2143_v0 = vmov 0   ;;  %vm101_vm0 = vcmask 261120   ;;  %v93_v1 = vld [vmem:[#allocation10 + $0x18] sm:$0xff]  ;;  %v92_v2 = vld [vmem:[#allocation10 + $0x10] sm:$0xff] }
  0x33   :  { %1978 = vset.pattern.permute.xlu0 %v2143_v0  ;;  %v91_v3 = vld [vmem:[#allocation10 + $0x8] sm:$0xff]  ;;  %v2214_v4 = vand.u32 4294901760, %v93_v1  ;;  %v2216_v5 = vand.u32 4294901760, %v92_v2  ;;  %v90_v7 = vld [vmem:[#allocation10] sm:$0xff]  ;;  %v89_v9 = vld [vmem:[#allocation5 + $0x8] sm:$0xff]  ;;  %v2144_v46 = vmov 0.0  }
  0x34   :  { %v2218_v6 = vand.u32 4294901760, %v91_v3  ;;  %v88_v8 = vld [vmem:[#allocation5] sm:$0xff]  ;;  %v2220_v10 = vand.u32 4294901760, %v90_v7  ;;  %v106_v12 = vsel %vm101_vm0, %v89_v9, 0  ;;  %v642_v13 = vld [vmem:[%s2408_s0] sm:$0xff]  ;;  %v656_v44 = vld [vmem:[#allocation11 + $0x10] sm:$0xff] }
  0x35   :  { %v103_v11 = vsel %vm101_vm0, %v88_v8, 0  ;;  %1789 = vmatprep.subr.mxu0 %v2214_v4  ;;  %v223_v14 = vsub.f32 %v93_v1, %v2214_v4  ;;  %v230_v16 = vsub.f32 %v92_v2, %v2216_v5  ;;  %v2232_v17 = vand.u32 4294901760, %v106_v12  ;;  %646 = vperm.xlu0 %1978, %v642_v13   ;;  %v657_v40 = vld [vmem:[#allocation11 + $0x18] sm:$0xff]  ;;  %v655_v51 = vld [vmem:[#allocation11 + $0x8] sm:$0xff]  ;;  %v654_v54 = vld [vmem:[#allocation11] sm:$0xff]  ;;  %s2146_s30 = smov 32  }
  0x36   :  { %v2229_v15 = vand.u32 4294901760, %v103_v11  ;;  %1790 = vmatpush3.msra.mxu0 %v2214_v4  ;;  %v237_v18 = vsub.f32 %v91_v3, %v2218_v6  ;;  %v244_v19 = vsub.f32 %v90_v7, %v2220_v10  ;;  %v2252_v41 = vand.u32 4294901760, %v657_v40  ;;  %v640_v49 = vld [vmem:[#allocation8] sm:$0xff]  ;;  %s2149_s12 = smov [#allocation14]  }
  0x37   :  { %1791 = vmatprep.subr.mxu0 %v2216_v5  ;;  %v224_v20 = vand.u32 4294901760, %v223_v14  ;;  %v231_v22 = vand.u32 4294901760, %v230_v16  ;;  %v2240_v23 = vsub.f32 %v106_v12, %v2232_v17  ;;  %v2279_v47 = vand.u32 4294901760, %v656_v44  ;;  %641 = vst.msk [vmem:[#allocation4] sm:$0xff] %vm101_vm0, %v640_v49  ;;  %v638_v9 = vld [vmem:[%s2410_s2] sm:$0xff]  ;;  %s2147_s2 = smov 64  }
  0x38   :  { %v178_v21 = vsub.f32 %v103_v11, %v2229_v15  ;;  %1808 = vmatprep.mubr.f32.mxu1 %v2229_v15  ;;  %1792 = vmatpush3.msra.mxu0 %v2216_v5  ;;  %v238_v24 = vand.u32 4294901760, %v237_v18  ;;  %v245_v25 = vand.u32 4294901760, %v244_v19  ;;  %v2259_v42 = vsub.f32 %v657_v40, %v2252_v41  ;;  %639 = vst.msk [vmem:[#allocation3] sm:$0xff] %vm101_vm0, %v638_v9  ;;  %s1671_s13 = sshll.u32 %s2149_s12, 4  ;;  %s1672_s13 = int_to_ptr.vmem [resolvable:$true] %s1671_s13 }
  0x39   :  { %1793 = vmatprep.subr.mxu0 %v2218_v6  ;;  %v225_v26 = vsub.f32 %v223_v14, %v224_v20  ;;  %v232_v28 = vsub.f32 %v230_v16, %v231_v22  ;;  %v189_v29 = vand.u32 4294901760, %v2240_v23  ;;  %v774_v50 = vsub.f32 %v656_v44, %v2279_v47  ;;  %s2067_s14 = scalar_lea.vmem %s1672_s13, 128  ;;  %p2072_p7 = scmp.lt.s32.totalorder %s1672_s13, %s1672_s13 }
  0x3a   :  { %v179_v27 = vand.u32 4294901760, %v178_v21  ;;  %1794 = vmatpush3.msra.mxu0 %v2218_v6  ;;  %v239_v30 = vsub.f32 %v237_v18, %v238_v24  ;;  %v246_v31 = vsub.f32 %v244_v19, %v245_v25  ;;  %v768_v43 = vand.u32 4294901760, %v2259_v42  ;;  %p2068_p6 = scmp.ne.s32.totalorder %s1672_s13, %s2067_s14  ;;  %p2073_p8 = scmp.lt.s32.totalorder %s2067_s14, %s2067_s14 }
  0x3b   :  { %1795 = vmatprep.subr.mxu0 %v2220_v10  ;;  %v226_v32 = vand.u32 4294901760, %v225_v26  ;;  %v233_v34 = vand.u32 4294901760, %v232_v28  ;;  %v190_v35 = vsub.f32 %v2240_v23, %v189_v29  ;;  %v2292_v52 = vand.u32 4294901760, %v655_v51 }
  0x3c   :  { %v180_v33 = vsub.f32 %v178_v21, %v179_v27  ;;  %1796 = vmatpush3.msra.mxu0 %v2220_v10  ;;  %v240_v38 = vand.u32 4294901760, %v239_v30  ;;  %v247_v39 = vand.u32 4294901760, %v246_v31  ;;  %v769_v45 = vsub.f32 %v2259_v42, %v768_v43  ;;  %p2074_p9 = por %p2073_p8, %p2072_p7 }
  0x3d   :  { %1800 = vmatprep.subr.mxu1 %v226_v32  ;;  %1811 = vmatprep.subr.mxu0 %v223_v14  ;;  %v191_v37 = vand.u32 4294901760, %v190_v35  ;;  %v781_v56 = vsub.f32 %v655_v51, %v2292_v52  ;;  %v775_v57 = vand.u32 4294901760, %v774_v50  ;;  %v2297_v58 = vand.u32 4294901760, %v654_v54 }
  0x3e   :  { %v181_v36 = vand.u32 4294901760, %v180_v33  ;;  %1801 = vmatpush3.msra.mxu1 %v226_v32  ;;  %v770_v48 = vand.u32 4294901760, %v769_v45  ;;  %v653_v53 = vld [vmem:[#allocation4] sm:$0xff]  ;;  %vm2145_vm1 = vmmov 0   ;;  %v643_v11 = vlaneseq  ;;  %p2075_p10 = pnand %p2074_p9, %p2068_p6 }
  0x3f   :  { %1802 = vmatprep.subr.mxu1 %v233_v34  ;;  %v660_v55 = vsel %vm101_vm0, %v653_v53, 0  ;;  %v776_v60 = vsub.f32 %v774_v50, %v775_v57  ;;  %v788_v61 = vsub.f32 %v654_v54, %v2297_v58  ;;  %v782_v62 = vand.u32 4294901760, %v781_v56 }
  0x40   :  { %1797 = vmatprep.mubr.f32.mxu0 %v181_v36  ;;  %1803 = vmatpush3.msra.mxu1 %v233_v34  ;;  %v2299_v59 = vand.u32 4294901760, %v660_v55  ;;  %v644_v12 = vand.u32 127, %v643_v11  ;;  %vm1147_vm3 = vcmask 130048  }
  0x41   :  { %1798 = vmatmul.mubr.f32.vlgmr.msra.gmra.mxu0 %v191_v37  ;;  %1804 = vmatprep.subr.mxu1 %v240_v38  ;;  %v777_v0 = vand.u32 4294901760, %v776_v60  ;;  %v783_v1 = vsub.f32 %v781_v56, %v782_v62  ;;  %v789_v3 = vand.u32 4294901760, %v788_v61 }
  0x42   :  { %1812 = vmatpush3.msra.mxu0 %v223_v14  ;;  %1805 = vmatpush3.msra.mxu1 %v240_v38  ;;  %v732_v63 = vsub.f32 %v660_v55, %v2299_v59 }
  0x43   :  { %1813 = vmatprep.subr.mxu0 %v230_v16  ;;  %1806 = vmatprep.subr.mxu1 %v247_v39 }
  0x44   :  { %1814 = vmatpush3.msra.mxu0 %v230_v16  ;;  %1807 = vmatpush3.msra.mxu1 %v247_v39  ;;  %v733_v2 = vand.u32 4294901760, %v732_v63 }
  0x45   :  { %1815 = vmatprep.subr.mxu0 %v237_v18  ;;  %1809 = vmatmul.mubr.f32.vlgmr.msra.gmra.mxu1 %v2232_v17 }
  0x46   :  { %1816 = vmatpush3.msra.mxu0 %v237_v18  ;;  %1822 = vmatprep.subr.mxu1 %v2214_v4 }
  0x47   :  { %1817 = vmatprep.subr.mxu0 %v244_v19  ;;  %1819 = vmatprep.mubr.f32.mxu0 %v178_v21 }
  0x48   :  { %1818 = vmatpush3.msra.mxu0 %v244_v19  ;;  %1823 = vmatpush3.msra.mxu1 %v2214_v4 }
  0x49   :  { %1820 = vmatmul.mubr.f32.vlgmr.msra.gmra.mxu0 %v2240_v23  ;;  %1824 = vmatprep.subr.mxu1 %v2216_v5 }
  0x4a   :  { %1833 = vmatprep.subr.mxu0 %v224_v20  ;;  %1825 = vmatpush3.msra.mxu1 %v2216_v5 }
  0x4b   :  { %1834 = vmatpush3.msra.mxu0 %v224_v20  ;;  %1826 = vmatprep.subr.mxu1 %v2218_v6 }
  0x4c   :  { %1835 = vmatprep.subr.mxu0 %v231_v22  ;;  %1827 = vmatpush3.msra.mxu1 %v2218_v6 }
  0x4d   :  { %1836 = vmatpush3.msra.mxu0 %v231_v22  ;;  %1828 = vmatprep.subr.mxu1 %v2220_v10 }
  0x4e   :  { %1837 = vmatprep.subr.mxu0 %v238_v24  ;;  %1829 = vmatpush3.msra.mxu1 %v2220_v10 }
  0x4f   :  { %1830 = vmatprep.mubr.f32.mxu1 %v179_v27  ;;  %1838 = vmatpush3.msra.mxu0 %v238_v24 }
  0x50   :  { %1831 = vmatmul.mubr.f32.vlgmr.msra.gmra.mxu1 %v189_v29  ;;  %1839 = vmatprep.subr.mxu0 %v245_v25 }
  0x51   :  { %1844 = vmatprep.subr.mxu1 %v2214_v4  ;;  %1840 = vmatpush3.msra.mxu0 %v245_v25 }
  0x52   :  { %1841 = vmatprep.mubr.f32.mxu0 %v2229_v15  ;;  %1845 = vmatpush3.msra.mxu1 %v2214_v4  ;;  %v784_v4 = vand.u32 4294901760, %v783_v1 }
  0x53   :  { %1842 = vmatmul.mubr.f32.vlgmr.msra.gmra.mxu0 %v2232_v17  ;;  %1846 = vmatprep.subr.mxu1 %v2216_v5 }
  0x54   :  { %1852 = vmatprep.mubr.f32.mxu1 %v2229_v15  ;;  %1847 = vmatpush3.msra.mxu1 %v2216_v5  ;;  %v734_v5 = vsub.f32 %v732_v63, %v733_v2  ;;  %v1699_v15 = vld [vmem:[%s2414_s6] ss:$0 sm:$0xff]  ;;  %s2148_s6 = smov 96  }
  0x55   :  { %1855 = vmatprep.subr.mxu0 %v2144_v46  ;;  %1848 = vmatprep.subr.mxu1 %v2218_v6 }
  0x56   :  { %1856 = vmatpush3.msra.mxu0 %v2252_v41  ;;  %1849 = vmatpush3.msra.mxu1 %v2218_v6  ;;  %v790_v6 = vsub.f32 %v788_v61, %v789_v3  ;;  %v735_v7 = vand.u32 4294901760, %v734_v5 }
  0x57   :  { %1857 = vmatprep.subr.mxu0 %v2144_v46  ;;  %1850 = vmatprep.subr.mxu1 %v2220_v10 }
  0x58   :  { %1858 = vmatpush3.msra.mxu0 %v2279_v47  ;;  %1851 = vmatpush3.msra.mxu1 %v2220_v10  ;;  %v791_v8 = vand.u32 4294901760, %v790_v6  ;;  %v1617_v10 = vld [vmem:[#allocation3] sm:$0xff] }
  0x59   :  { %1859 = vmatprep.subr.mxu0 %v2144_v46  ;;  %1853 = vmatmul.mubr.f32.vlgmr.msra.gmra.mxu1 %v2232_v17 }
  0x5a   :  { %1866 = vmatprep.subr.mxu1 %v2144_v46  ;;  %1860 = vmatpush3.msra.mxu0 %v2292_v52 }
  0x5b   :  { %1867 = vmatpush3.msra.mxu1 %v770_v48  ;;  %1861 = vmatprep.subr.mxu0 %v2144_v46 }
  0x5c   :  { %1868 = vmatprep.subr.mxu1 %v2144_v46  ;;  %1862 = vmatpush3.msra.mxu0 %v2297_v58 }
  0x5d   :  { %1877 = vmatprep.subr.mxu0 %v2144_v46  ;;  %1869 = vmatpush3.msra.mxu1 %v777_v0 }
  0x5e   :  { %1863 = vmatprep.mubr.msk.f32.mxu0 %vm2145_vm1, %v2144_v46  ;;  %1870 = vmatprep.subr.mxu1 %v2144_v46 }
  0x5f   :  { %1874 = vmatprep.mubr.msk.f32.mxu1 %vm2145_vm1, %v2144_v46  ;;  %1871 = vmatpush3.msra.mxu1 %v784_v4 }
  0x60   :  { %1872 = vmatprep.subr.mxu1 %v2144_v46  ;;  %1864 = vmatmul.mubr.f32.vlgmr.msra.gmra.mxu0 %v735_v7 }
  0x61   :  { %1873 = vmatpush3.msra.mxu1 %v791_v8  ;;  %1878 = vmatpush3.msra.mxu0 %v2259_v42 }
  0x62   :  { %1888 = vmatprep.subr.mxu1 %v2144_v46  ;;  %1879 = vmatprep.subr.mxu0 %v2144_v46 }
  0x63   :  { %1875 = vmatmul.mubr.f32.vlgmr.msra.gmra.mxu1 %v2299_v59  ;;  %1880 = vmatpush3.msra.mxu0 %v774_v50 }
  0x64   :  { %1889 = vmatpush3.msra.mxu1 %v2252_v41  ;;  %1881 = vmatprep.subr.mxu0 %v2144_v46 }
  0x65   :  { %1890 = vmatprep.subr.mxu1 %v2144_v46  ;;  %1882 = vmatpush3.msra.mxu0 %v781_v56 }
  0x66   :  { %1891 = vmatpush3.msra.mxu1 %v2279_v47  ;;  %1883 = vmatprep.subr.mxu0 %v2144_v46 }
  0x67   :  { %1892 = vmatprep.subr.mxu1 %v2144_v46  ;;  %1884 = vmatpush3.msra.mxu0 %v788_v61 }
  0x68   :  { %1893 = vmatpush3.msra.mxu1 %v2292_v52  ;;  %1885 = vmatprep.mubr.msk.f32.mxu0 %vm2145_vm1, %v2144_v46 }
  0x69   :  { %1894 = vmatprep.subr.mxu1 %v2144_v46  ;;  %1899 = vmatprep.subr.mxu0 %v2144_v46 }
  0x6a   :  { %1886 = vmatmul.mubr.f32.vlgmr.msra.gmra.mxu0 %v732_v63  ;;  %1895 = vmatpush3.msra.mxu1 %v2297_v58 }
  0x6b   :  { %1900 = vmatpush3.msra.mxu0 %v768_v43  ;;  %1896 = vmatprep.mubr.msk.f32.mxu1 %vm2145_vm1, %v2144_v46 }
  0x6c   :  { %1901 = vmatprep.subr.mxu0 %v2144_v46  ;;  %1910 = vmatprep.subr.mxu1 %v2144_v46 }
  0x6d   :  { %1897 = vmatmul.mubr.f32.vlgmr.msra.gmra.mxu1 %v733_v2  ;;  %1902 = vmatpush3.msra.mxu0 %v775_v57 }
  0x6e   :  { %1911 = vmatpush3.msra.mxu1 %v2252_v41  ;;  %1903 = vmatprep.subr.mxu0 %v2144_v46 }
  0x6f   :  { %1912 = vmatprep.subr.mxu1 %v2144_v46  ;;  %1904 = vmatpush3.msra.mxu0 %v782_v62 }
  0x70   :  { %1913 = vmatpush3.msra.mxu1 %v2279_v47  ;;  %1905 = vmatprep.subr.mxu0 %v2144_v46 }
  0x71   :  { %1914 = vmatprep.subr.mxu1 %v2144_v46  ;;  %1906 = vmatpush3.msra.mxu0 %v789_v3 }
  0x72   :  { %1907 = vmatprep.mubr.msk.f32.mxu0 %vm2145_vm1, %v2144_v46  ;;  %1915 = vmatpush3.msra.mxu1 %v2292_v52 }
  0x73   :  { %1908 = vmatmul.mubr.f32.vlgmr.msra.gmra.mxu0 %v2299_v59  ;;  %1916 = vmatprep.subr.mxu1 %v2144_v46 }
  0x74   :  { %1918 = vmatprep.mubr.msk.f32.mxu1 %vm2145_vm1, %v2144_v46  ;;  %1917 = vmatpush3.msra.mxu1 %v2297_v58 }
  0x75   :  { %1921 = vmatprep.subr.mxu0 %v2144_v46  ;;  %1919 = vmatmul.mubr.f32.vlgmr.msra.gmra.mxu1 %v2299_v59 }
  0x76   :  { %1925 = vmatprep.mubr.msk.f32.mxu0 %vm2145_vm1, %v2144_v46  ;;  %1928 = vmatprep.subr.mxu1 %v2144_v46 }
  0x77   :  { %1932 = vmatprep.mubr.msk.f32.mxu1 %vm2145_vm1, %v2144_v46  ;;  %1619 = vrot.lane.b32.xlu1 %v1617_v10, %s2146_s30 }
  0xb0   :  { %v647_v14 = vpop.permute.xlu0 %646 }
  0xb1   :  { %vm648_vm2 = vcmp.eq.s32.totalorder %v644_v12, %v647_v14 }
  0xb2   :  { %v2364_v19 = vsel %vm648_vm2, 1.0, %v2144_v46 }
  0xb3   :  { %v1149_v24 = vsel %vm1147_vm3, %v2364_v19, 0 }
  0xb4   :  { %v1219_v28 = vsub.f32 %v1149_v24, %v1149_v24 }
  0xb6   :  { %v1220_v34 = vand.u32 4294901760, %v1219_v28 }
  0xb8   :  { %v1221_v39 = vsub.f32 %v1219_v28, %v1220_v34 }
  0xba   :  { %v1222_v45 = vand.u32 4294901760, %v1221_v39 }
 0x101   :  { %v1799_v13 = vpop.f32.mrf.mxu0 }
 0x102   :  { %v194_v18 = vadd.f32 %v1799_v13, %v1699_v15 }
 0x103   :  { %v183_v16 = vpop.f32.mrf.mxu0 }
 0x104   :  { %v184_v20 = vadd.f32 %v1699_v15, %v183_v16 }
 0x105   :  { %v1810_v17 = vpop.f32.mrf.mxu1 }
 0x106   :  { %v291_v23 = vadd.f32 %v1810_v17, %v194_v18 }
 0x107   :  { %v284_v21 = vpop.f32.mrf.mxu1 }
 0x108   :  { %v285_v26 = vadd.f32 %v284_v21, %v184_v20 }
 0x109   :  { %v1821_v22 = vpop.f32.mrf.mxu0 }
 0x10a   :  { %v378_v29 = vadd.f32 %v1821_v22, %v291_v23 }
 0x10b   :  { %v370_v27 = vpop.f32.mrf.mxu0 }
 0x10c   :  { %v371_v32 = vadd.f32 %v370_v27, %v285_v26 }
 0x110   :  { %v1832_v25 = vpop.f32.mrf.mxu1 }
 0x111   :  { %v463_v33 = vadd.f32 %v1832_v25, %v378_v29 }
 0x112   :  { %v454_v30 = vpop.f32.mrf.mxu1 }
 0x113   :  { %v1843_v31 = vpop.f32.mrf.mxu0  ;;  %v455_v35 = vadd.f32 %v454_v30, %v371_v32 }
 0x114   :  { %v552_v37 = vadd.f32 %v1843_v31, %v463_v33  ;;  %v1620_v33 = vpop.permute.xlu1 %1619 }
 0x115   :  { %v545_v36 = vpop.f32.mrf.mxu0 }
 0x116   :  { %v546_v40 = vadd.f32 %v545_v36, %v455_v35 }
 0x119   :  { %v1854_v38 = vpop.f32.mrf.mxu1 }
 0x11a   :  { %v633_v41 = vadd.f32 %v1854_v38, %v552_v37 }
 0x11b   :  { %v626_v42 = vpop.f32.mrf.mxu1 }
 0x11c   :  { %v1180_v43 = vand.u32 4294901760, %v633_v41  ;;  %v627_v44 = vadd.f32 %v626_v42, %v546_v40 }
 0x11e   :  { %v1258_v47 = vsub.f32 %v633_v41, %v1180_v43  ;;  %v1183_v48 = vand.u32 4294901760, %v627_v44  ;;  %1922 = vmatpush3.msra.mxu0 %v1180_v43 }
 0x11f   :  { %1923 = vmatprep.subr.mxu0 %v2144_v46 }
 0x120   :  { %v1259_v49 = vand.u32 4294901760, %v1258_v47  ;;  %v1265_v50 = vsub.f32 %v627_v44, %v1183_v48  ;;  %1924 = vmatpush3.msra.mxu0 %v1183_v48  ;;  %v737_v56 = vpop.f32.mrf.mxu0 }
 0x121   :  { %1926 = vmatmul.mubr.f32.vlgmr.msra.gmra.mxu0 %v1222_v45  ;;  %1935 = vmatprep.subr.mxu0 %v2144_v46 }
 0x122   :  { %v1260_v51 = vsub.f32 %v1258_v47, %v1259_v49  ;;  %v1266_v52 = vand.u32 4294901760, %v1265_v50  ;;  %1936 = vmatpush3.msra.mxu0 %v1258_v47  ;;  %1939 = vmatprep.mubr.msk.f32.mxu0 %vm2145_vm1, %v2144_v46  ;;  %v1865_v57 = vpop.f32.mrf.mxu0 }
 0x123   :  { %1937 = vmatprep.subr.mxu0 %v2144_v46  ;;  %v828_v58 = vpop.f32.mrf.mxu1 }
 0x124   :  { %v1267_v53 = vsub.f32 %v1265_v50, %v1266_v52  ;;  %1938 = vmatpush3.msra.mxu0 %v1265_v50  ;;  %v1261_v54 = vand.u32 4294901760, %v1260_v51  ;;  %v829_v59 = vadd.f32 %v828_v58, %v737_v56 }
 0x125   :  { %1940 = vmatmul.mubr.f32.vlgmr.msra.gmra.mxu0 %v1219_v28  ;;  %1949 = vmatprep.subr.mxu0 %v2144_v46  ;;  %v1876_v60 = vpop.f32.mrf.mxu1 }
 0x126   :  { %1929 = vmatpush3.msra.mxu1 %v1261_v54  ;;  %1950 = vmatpush3.msra.mxu0 %v1259_v49  ;;  %v1268_v55 = vand.u32 4294901760, %v1267_v53 }
 0x127   :  { %1930 = vmatprep.subr.mxu1 %v2144_v46  ;;  %1951 = vmatprep.subr.mxu0 %v2144_v46 }
 0x128   :  { %1931 = vmatpush3.msra.mxu1 %v1268_v55  ;;  %1952 = vmatpush3.msra.mxu0 %v1266_v52 }
 0x129   :  { %1953 = vmatprep.mubr.msk.f32.mxu0 %vm2145_vm1, %v2144_v46  ;;  %1933 = vmatmul.mubr.msk.f32.vlgmr.msra.gmra.mxu1 %vm1147_vm3, %v2364_v19 }
 0x12a   :  { %1942 = vmatprep.subr.mxu1 %v2144_v46  ;;  %1954 = vmatmul.mubr.msk.f32.vlgmr.msra.gmra.mxu0 %vm1147_vm3, %v2364_v19  ;;  %v908_v61 = vpop.f32.mrf.mxu0 }
 0x12b   :  { %1943 = vmatpush3.msra.mxu1 %v1180_v43  ;;  %1946 = vmatprep.mubr.msk.f32.mxu1 %vm2145_vm1, %v2144_v46  ;;  %v909_v62 = vadd.f32 %v908_v61, %v829_v59 }
 0x12c   :  { %1944 = vmatprep.subr.mxu1 %v2144_v46  ;;  %v1887_v63 = vpop.f32.mrf.mxu0 }
 0x12d   :  { %1945 = vmatpush3.msra.mxu1 %v1183_v48  ;;  %v985_v0 = vpop.f32.mrf.mxu1 }
 0x12e   :  { %1947 = vmatmul.mubr.f32.vlgmr.msra.gmra.mxu1 %v1220_v34  ;;  %1956 = vmatprep.subr.mxu1 %v2144_v46  ;;  %v986_v1 = vadd.f32 %v985_v0, %v909_v62 }
 0x12f   :  { %1957 = vmatpush3.msra.mxu1 %v1180_v43  ;;  %1960 = vmatprep.mubr.msk.f32.mxu1 %vm2145_vm1, %v2144_v46  ;;  %v1898_v2 = vpop.f32.mrf.mxu1 }
 0x130   :  { %1958 = vmatprep.subr.mxu1 %v2144_v46 }
 0x131   :  { %1959 = vmatpush3.msra.mxu1 %v1183_v48 }
 0x132   :  { %1961 = vmatmul.mubr.msk.f32.vlgmr.msra.gmra.mxu1 %vm1147_vm3, %v2364_v19 }
 0x133   :  { %v1068_v3 = vpop.f32.mrf.mxu0 }
 0x134   :  { %v1069_v4 = vadd.f32 %v1068_v3, %v986_v1 }
 0x135   :  { %v1909_v5 = vpop.f32.mrf.mxu0  ;;  %v1143_v6 = vpop.f32.mrf.mxu1 }
 0x136   :  { %v1144_v46 = vadd.f32 %v1143_v6, %v1069_v4 }
 0x137   :  { %v1920_v7 = vpop.f32.mrf.mxu1 }
 0x1e1   :  { %v1224_v8 = vpop.f32.mrf.mxu0 }
 0x1e2   :  { %v1225_v12 = vadd.f32 %v1224_v8, %v1144_v46 }
 0x1e3   :  { %v1927_v9 = vpop.f32.mrf.mxu0 }
 0x1e5   :  { %v1381_v10 = vpop.f32.mrf.mxu0 }
 0x1e7   :  { %v1941_v11 = vpop.f32.mrf.mxu0 }
 0x1e9   :  { %v1305_v13 = vpop.f32.mrf.mxu1 }
 0x1ea   :  { %v1306_v14 = vadd.f32 %v1305_v13, %v1225_v12  ;;  %v1533_v15 = vpop.f32.mrf.mxu0 }
 0x1eb   :  { %v1934_v16 = vpop.f32.mrf.mxu1 }
 0x1ec   :  { %v1955_v17 = vpop.f32.mrf.mxu0  ;;  %v1382_v18 = vadd.f32 %v1381_v10, %v1306_v14 }
 0x1ee   :  { %v1456_v19 = vpop.f32.mrf.mxu1 }
 0x1ef   :  { %v1457_v20 = vadd.f32 %v1456_v19, %v1382_v18 }
 0x1f0   :  { %v1948_v21 = vpop.f32.mrf.mxu1 }
 0x1f1   :  { %v1534_v22 = vadd.f32 %v1533_v15, %v1457_v20 }
 0x1f2   :  { %v1606_v23 = vpop.f32.mrf.mxu1 }
 0x1f3   :  { %v1607_v24 = vadd.f32 %v1606_v23, %v1534_v22 }
 0x1f4   :  { %v1962_v25 = vpop.f32.mrf.mxu1 }
 0x1f5   :  { %1979 = vtanh.f32 %v1607_v24  ;;  %v1704_v27 = vmul.f32 -1.442695, %v1607_v24 }
 0x1f7   :  { %1981 = vpow2.f32 %v1704_v27 }
 0x202   :  { %v1980_v26 = vpop.eup %1979 }
 0x203   :  { %1624 = vrot.lane.b32.xlu0 %v1980_v26, %s2147_s2 }
 0x204   :  { %v1982_v28 = vpop.eup %1981 }
 0x205   :  { %v1613_v29 = vadd.f32 1.0, %v1982_v28 }
 0x207   :  { %1983 = vrcp.f32 %v1613_v29 }
 0x214   :  { %v1984_v30 = vpop.eup %1983 }
 0x215   :  { %v1622_v34 = vmul.f32 %v1984_v30, %v1620_v33 }
 0x275   :  { %v1625_v31 = vpop.permute.xlu0 %1624 }
 0x276   :  { %v1627_v32 = vmul.f32 %v1984_v30, %v1625_v31 }
 0x278   :  { %1629 = vrot.lane.b32.xlu1 %v1627_v32, %s2146_s30 }
 0x2ea   :  { %v1630_v35 = vpop.permute.xlu1 %1629 }
 0x2eb   :  { %v1632_v36 = vadd.f32 %v1630_v35, %v1622_v34 }
 0x2ed   :  { %1985 = vtanh.f32 %v1632_v36  ;;  %1640 = vrot.lane.b32.xlu1 %v1632_v36, %s2148_s6 }
 0x2fa   :  { %v1986_v37 = vpop.eup %1985 }
 0x2fb   :  { %1635 = vrot.lane.b32.xlu0 %v1986_v37, %s2147_s2 }
 0x35f   :  { %v1641_v38 = vpop.permute.xlu1 %1640 }
 0x360   :  { %1643 = vst.msk [vmem:[#allocation3] sm:$0xff] %vm101_vm0, %v1641_v38  ;;  %1653 = vst.msk [vmem:[#allocation14] sm:$0xff] %vm101_vm0, %v1641_v38 }
 0x361   :  { %2078 = shalt.err (!%p2075_p10)
}
 0x362   :  { %1674 = dma.vmem_to_hbm [thread:$0]  %s1672_s13, 128, %s2416_s8, [#allocation15]  }
 0x363   :  { %s2150_s17 = smov [#allocation13]   ;;  %s2151_s19 = smov [#allocation16]  }
 0x364   :  { %s1661_s18 = sshll.u32 %s2150_s17, 4  ;;  %s1681_s20 = sshll.u32 %s2151_s19, 4  ;;  %s1662_s18 = int_to_ptr.vmem [resolvable:$true] %s1661_s18  ;;  %s1682_s20 = int_to_ptr.vmem [resolvable:$true] %s1681_s20 }
 0x365   :  { %s2087_s21 = scalar_lea.vmem %s1662_s18, 128  ;;  %p2092_p12 = scmp.lt.s32.totalorder %s1662_s18, %s1662_s18 }
 0x366   :  { %p2088_p11 = scmp.ne.s32.totalorder %s1662_s18, %s2087_s21  ;;  %p2093_p13 = scmp.lt.s32.totalorder %s2087_s21, %s2087_s21 }
 0x368   :  { %p2094_p0 = por %p2093_p13, %p2092_p12 }
 0x36a   :  { %p2095_p1 = pnand %p2094_p0, %p2088_p11 }
 0x36d   :  { %v1636_v39 = vpop.permute.xlu0 %1635 }
 0x36e   :  { %v1638_v40 = vmul.f32 %v1984_v30, %v1636_v39 }
 0x370   :  { %1645 = vrot.lane.b32.xlu0 %v1638_v40, %s2146_s30 }
 0x3e2   :  { %v1646_v41 = vpop.permute.xlu0 %1645 }
 0x3e3   :  { %1648 = vst.msk [vmem:[#allocation4] sm:$0xff] %vm101_vm0, %v1646_v41  ;;  %1654 = vst.msk [vmem:[#allocation16] sm:$0xff] %vm101_vm0, %v1646_v41 }
 0x3e4   :  { %1649 = vst.msk [vmem:[#allocation13] sm:$0xff] %vm101_vm0, %v1646_v41 }
 0x3e5   :  { %2098 = shalt.err (!%p2095_p1)
}
 0x3e6   :  { %1664 = dma.vmem_to_hbm [thread:$0]  %s1662_s18, 128, %s2415_s7, [#allocation7]  }
 0x3e7   :  { %s2107_s23 = scalar_lea.vmem %s1682_s20, 128  ;;  %p2112_p3 = scmp.lt.s32.totalorder %s1682_s20, %s1682_s20 }
 0x3e8   :  { %p2108_p2 = scmp.ne.s32.totalorder %s1682_s20, %s2107_s23  ;;  %p2113_p4 = scmp.lt.s32.totalorder %s2107_s23, %s2107_s23 }
 0x3ea   :  { %p2114_p5 = por %p2113_p4, %p2112_p3 }
 0x3ec   :  { %p2115_p6 = pnand %p2114_p5, %p2108_p2 }
 0x3ee   :  { %2118 = shalt.err (!%p2115_p6)
}
 0x3ef   :  { %1684 = dma.vmem_to_hbm [thread:$0]  %s1682_s20, 128, %s2417_s9, [#allocation15]  }
 0x3f0   :  { %2133 = dma.done.wait [#allocation7], 128  }
 0x3f1   :  { %2134 = vsyncadd [#allocation7], 4294967168 }
 0x3f2   :  { %2135 = dma.done.wait [#allocation15], 256  }
 0x3f3   :  { %2136 = vsyncadd [#allocation15], 4294967040 }
 0x3f4   :  { %1694 = vsyncpa [#allocation6], 1 }
 0x3f5   :  { %1695 = vsyncpa [#allocation9], 1 }
 0x3f6   :  { %1696 = vsyncpa [#allocation12], 1 }
 0x3f7   :  { %1697 = vsyncpa [#allocation7], 1 }
 0x3f8   :  { %1698 = vsyncpa [#allocation15], 1 }

</bundles_post_ra>
